<compile_context>
chip_gen: v7x
topology: tpu7x:2x2x1
jax: 0.10.0
libtpu: 0.0.40
codegen_flags: <defaults>
</compile_context>

<pallas_src>
import jax
import jax.numpy as jnp
from jax.experimental import pallas as pl
from jax.experimental.pallas import tpu as pltpu

BN_EPS = 1e-5
MXU_DTYPE = jnp.bfloat16   # conv matmul operand dtype (accumulation stays f32)


# ------------------------------- kernel --------------------------------------

def residual_block_kernel(x_ref, lidx_ref,
                          w1_ref, g1_ref, b1_ref,
                          w2_ref, g2_ref, b2_ref,
                          w3_ref, g3_ref, b3_ref,
                          wp_ref, gp_ref, bp_ref,
                          o_ref):
    N, _cin, L = x_ref.shape
    NL = N * L

    # Assemble the NCL input into one (Cin, N*L) matrix: channels on sublanes,
    # flattened batch*length on lanes (lane-dense working layout).
    x = jnp.concatenate([x_ref[n] for n in range(N)], axis=1)   # (Cin, N*L)

    # Position-in-sequence (0..L-1) of every flattened column; used to mask
    # the SAME-padding / batch boundaries of each conv tap.
    l_idx = lidx_ref[...]                                       # (1, N*L) int32

    def conv_same(h, w_ref, k):
        """TF-SAME stride-1 conv1d as a single im2col matmul on the MXU."""
        c = h.shape[0]
        pad_l, pad_r = (k - 1) // 2, k // 2
        if k == 1:
            cols = h                                            # 1x1 conv
        else:
            # Value-level zero extension: no scratch buffer, no full zeroing.
            h_ext = jnp.concatenate(
                [jnp.zeros((c, pad_l), h.dtype), h,
                 jnp.zeros((c, pad_r), h.dtype)], axis=1)       # (C, NL+k-1)
            pieces = []
            for t in range(k):
                s = t - pad_l                                   # spatial offset
                shifted = h_ext[:, t:t + NL]                    # h shifted by s
                valid = jnp.logical_and(l_idx + s >= 0, l_idx + s < L)
                pieces.append(jnp.where(valid, shifted, 0.0))
            cols = jnp.concatenate(pieces, axis=0)              # (k*C, N*L)
        # One MXU matmul with K = k*Cin; bf16 operands, f32 accumulate.
        return jnp.dot(w_ref[...], cols.astype(MXU_DTYPE),
                       preferred_element_type=jnp.float32)      # (Cout, N*L)

    def bn(y, g_ref, b_ref):
        """Training-mode BatchNorm1d (batch stats, biased var), single pass."""
        inv_n = 1.0 / NL
        mean = jnp.sum(y, axis=1, keepdims=True) * inv_n
        msq = jnp.sum(y * y, axis=1, keepdims=True) * inv_n
        var = jnp.maximum(msq - mean * mean, 0.0)               # guard cancel.
        scale = jax.lax.rsqrt(var + BN_EPS) * g_ref[...]
        return (y - mean) * scale + b_ref[...]

    h = jnp.maximum(bn(conv_same(x, w1_ref, 8), g1_ref, b1_ref), 0.0)
    h = jnp.maximum(bn(conv_same(h, w2_ref, 5), g2_ref, b2_ref), 0.0)
    h = bn(conv_same(h, w3_ref, 3), g3_ref, b3_ref)
    p = bn(conv_same(x, wp_ref, 1), gp_ref, bp_ref)             # projection
    out = jnp.maximum(h + p, 0.0)                               # (Cout, N*L)

    # Store straight back into the PyTorch NCL layout.
    for n in range(N):
        o_ref[n] = out[:, n * L:(n + 1) * L].astype(o_ref.dtype)


# ------------------------------ wrapper ---------------------------------------

def residual_block(x_ncl, params):
    N, _cin, L = x_ncl.shape
    cout = params["w3"].shape[0]

    def kconv(w):
        # PyTorch (Cout, Cin, K) -> (Cout, K*Cin); columns ordered tap-major /
        # cin-minor to match the kernel's im2col row order; bf16 MXU operand.
        co, ci, k = w.shape
        return jnp.transpose(w, (0, 2, 1)).reshape(co, k * ci).astype(MXU_DTYPE)

    def kvec(v):                     # (C,) -> (C, 1) f32 (per-channel column)
        return v.reshape(-1, 1).astype(jnp.float32)

    # Position-in-sequence of every flattened (N*L) column.
    l_idx = jnp.broadcast_to(jnp.arange(L, dtype=jnp.int32)[None, :],
                             (N, L)).reshape(1, N * L)

    args = (x_ncl.astype(jnp.float32), l_idx,
            kconv(params["w1"]), kvec(params["g1"]), kvec(params["b1"]),
            kconv(params["w2"]), kvec(params["g2"]), kvec(params["b2"]),
            kconv(params["w3"]), kvec(params["g3"]), kvec(params["b3"]),
            kconv(params["wp"]), kvec(params["gp"]), kvec(params["bp"]))

    vmem = pl.BlockSpec(memory_space=pltpu.MemorySpace.VMEM)
    return pl.pallas_call(
        residual_block_kernel,
        out_shape=jax.ShapeDtypeStruct((N, cout, L), jnp.float32),
        in_specs=[vmem] * len(args),
        out_specs=vmem,
    )(*args)


# ----------------------- pure-JAX reference (for checking) -------------------

def residual_block_ref(x, p):
    def conv_same(x, w):
        k = w.shape[-1]
        return jax.lax.conv_general_dilated(
            x, w, window_strides=(1,), padding=[((k - 1) // 2, k // 2)],
            dimension_numbers=("NCH", "OIH", "NCH"),
            precision=jax.lax.Precision.HIGHEST)

    def bn(y, g, b):
        m = jnp.mean(y, axis=(0, 2), keepdims=True)
        v = jnp.mean(jnp.square(y - m), axis=(0, 2), keepdims=True)
        return ((y - m) * jax.lax.rsqrt(v + BN_EPS)
                * g[None, :, None] + b[None, :, None])

    h = jax.nn.relu(bn(conv_same(x, p["w1"]), p["g1"], p["b1"]))
    h = jax.nn.relu(bn(conv_same(h, p["w2"]), p["g2"], p["b2"]))
    h = bn(conv_same(h, p["w3"]), p["g3"], p["b3"])
    proj = bn(conv_same(x, p["wp"]), p["gp"], p["bp"])
    return jax.nn.relu(h + proj)


# --------------------------------- main ---------------------------------------

if __name__ == "__main__":
    N, CIN, CMID, COUT, L = 2, 4, 8, 16, 16

    key = jax.random.PRNGKey(0)
    ks = jax.random.split(key, 13)

    params = {
        "w1": 0.2 * jax.random.normal(ks[0], (CMID, CIN, 8), jnp.float32),
        "g1": 1.0 + 0.1 * jax.random.normal(ks[1], (CMID,), jnp.float32),
        "b1": 0.1 * jax.random.normal(ks[2], (CMID,), jnp.float32),
        "w2": 0.2 * jax.random.normal(ks[3], (CMID, CMID, 5), jnp.float32),
        "g2": 1.0 + 0.1 * jax.random.normal(ks[4], (CMID,), jnp.float32),
        "b2": 0.1 * jax.random.normal(ks[5], (CMID,), jnp.float32),
        "w3": 0.2 * jax.random.normal(ks[6], (COUT, CMID, 3), jnp.float32),
        "g3": 1.0 + 0.1 * jax.random.normal(ks[7], (COUT,), jnp.float32),
        "b3": 0.1 * jax.random.normal(ks[8], (COUT,), jnp.float32),
        "wp": 0.2 * jax.random.normal(ks[9], (COUT, CIN, 1), jnp.float32),
        "gp": 1.0 + 0.1 * jax.random.normal(ks[10], (COUT,), jnp.float32),
        "bp": 0.1 * jax.random.normal(ks[11], (COUT,), jnp.float32),
    }

    x = jax.random.normal(ks[12], (N, CIN, L), jnp.float32)  # PyTorch NCL input

    out = residual_block(x, params)
    out = jax.block_until_ready(out)

    assert out.shape == (N, COUT, L), out.shape

    ref = residual_block_ref(x, params)
    # bf16 MXU operands (f32 accumulate) -> compare vs. f32 reference with a
    # bf16-appropriate tolerance.
    assert bool(jnp.allclose(out, ref, atol=3e-2, rtol=3e-2)), (
        float(jnp.max(jnp.abs(out - ref))))

    print("KERNEL_OK")
</pallas_src>

<mosaic_0001>
module attributes {stable_mosaic.version = 11 : i64} {
  func.func @residual_block_kernel(%arg0: memref<2x4x16xf32, #tpu.memory_space<vmem>>, %arg1: memref<1x32xi32, #tpu.memory_space<vmem>>, %arg2: memref<8x32xbf16, #tpu.memory_space<vmem>>, %arg3: memref<8x1xf32, #tpu.memory_space<vmem>>, %arg4: memref<8x1xf32, #tpu.memory_space<vmem>>, %arg5: memref<8x40xbf16, #tpu.memory_space<vmem>>, %arg6: memref<8x1xf32, #tpu.memory_space<vmem>>, %arg7: memref<8x1xf32, #tpu.memory_space<vmem>>, %arg8: memref<16x24xbf16, #tpu.memory_space<vmem>>, %arg9: memref<16x1xf32, #tpu.memory_space<vmem>>, %arg10: memref<16x1xf32, #tpu.memory_space<vmem>>, %arg11: memref<16x4xbf16, #tpu.memory_space<vmem>>, %arg12: memref<16x1xf32, #tpu.memory_space<vmem>>, %arg13: memref<16x1xf32, #tpu.memory_space<vmem>>, %arg14: memref<2x16x16xf32, #tpu.memory_space<vmem>>) attributes {dimension_semantics = [], scalar_prefetch = 0 : i64, scratch_operands = 0 : i64, tpu.core_type = #tpu.core_type<tc>} {
    %c0 = arith.constant 0 : index
    %c0_0 = arith.constant 0 : index
    %c0_1 = arith.constant 0 : index
    %0 = vector.load %arg0[%c0, %c0_0, %c0_1] : memref<2x4x16xf32, #tpu.memory_space<vmem>>, vector<1x4x16xf32>
    %1 = vector.shape_cast %0 : vector<1x4x16xf32> to vector<4x16xf32>
    %c1 = arith.constant 1 : index
    %c0_2 = arith.constant 0 : index
    %c0_3 = arith.constant 0 : index
    %2 = vector.load %arg0[%c1, %c0_2, %c0_3] : memref<2x4x16xf32, #tpu.memory_space<vmem>>, vector<1x4x16xf32>
    %3 = vector.shape_cast %2 : vector<1x4x16xf32> to vector<4x16xf32>
    %4 = tpu.concatenate %1, %3 in 1 : vector<4x16xf32>, vector<4x16xf32> -> vector<4x32xf32>
    %c0_4 = arith.constant 0 : index
    %c0_5 = arith.constant 0 : index
    %5 = vector.load %arg1[%c0_4, %c0_5] : memref<1x32xi32, #tpu.memory_space<vmem>>, vector<1x32xi32>
    %cst = arith.constant 0.000000e+00 : f32
    %6 = vector.broadcast %cst : f32 to vector<4x3xf32>
    %cst_6 = arith.constant 0.000000e+00 : f32
    %7 = vector.broadcast %cst_6 : f32 to vector<4x4xf32>
    %8 = tpu.concatenate %6, %4, %7 in 1 : vector<4x3xf32>, vector<4x32xf32>, vector<4x4xf32> -> vector<4x39xf32>
    %9 = vector.extract_strided_slice %8 {offsets = [0, 0], sizes = [4, 32], strides = [1, 1]} : vector<4x39xf32> to vector<4x32xf32>
    %c-3_i32 = arith.constant -3 : i32
    %10 = vector.broadcast %c-3_i32 : i32 to vector<1x32xi32>
    %11 = arith.addi %5, %10 : vector<1x32xi32>
    %c0_i32 = arith.constant 0 : i32
    %12 = vector.broadcast %c0_i32 : i32 to vector<1x32xi32>
    %13 = arith.cmpi sge, %11, %12 : vector<1x32xi32>
    %c-3_i32_7 = arith.constant -3 : i32
    %14 = vector.broadcast %c-3_i32_7 : i32 to vector<1x32xi32>
    %15 = arith.addi %5, %14 : vector<1x32xi32>
    %c16_i32 = arith.constant 16 : i32
    %16 = vector.broadcast %c16_i32 : i32 to vector<1x32xi32>
    %17 = arith.cmpi slt, %15, %16 : vector<1x32xi32>
    %18 = arith.andi %13, %17 : vector<1x32xi1>
    %cst_8 = arith.constant 0.000000e+00 : f32
    %19 = vector.shape_cast %18 : vector<1x32xi1> to vector<1x32xi1>
    %20 = vector.broadcast %19 : vector<1x32xi1> to vector<4x32xi1>
    %21 = vector.broadcast %cst_8 : f32 to vector<4x32xf32>
    %22 = arith.select %20, %9, %21 : vector<4x32xi1>, vector<4x32xf32>
    %23 = vector.extract_strided_slice %8 {offsets = [0, 1], sizes = [4, 32], strides = [1, 1]} : vector<4x39xf32> to vector<4x32xf32>
    %c-2_i32 = arith.constant -2 : i32
    %24 = vector.broadcast %c-2_i32 : i32 to vector<1x32xi32>
    %25 = arith.addi %5, %24 : vector<1x32xi32>
    %c0_i32_9 = arith.constant 0 : i32
    %26 = vector.broadcast %c0_i32_9 : i32 to vector<1x32xi32>
    %27 = arith.cmpi sge, %25, %26 : vector<1x32xi32>
    %c-2_i32_10 = arith.constant -2 : i32
    %28 = vector.broadcast %c-2_i32_10 : i32 to vector<1x32xi32>
    %29 = arith.addi %5, %28 : vector<1x32xi32>
    %c16_i32_11 = arith.constant 16 : i32
    %30 = vector.broadcast %c16_i32_11 : i32 to vector<1x32xi32>
    %31 = arith.cmpi slt, %29, %30 : vector<1x32xi32>
    %32 = arith.andi %27, %31 : vector<1x32xi1>
    %cst_12 = arith.constant 0.000000e+00 : f32
    %33 = vector.shape_cast %32 : vector<1x32xi1> to vector<1x32xi1>
    %34 = vector.broadcast %33 : vector<1x32xi1> to vector<4x32xi1>
    %35 = vector.broadcast %cst_12 : f32 to vector<4x32xf32>
    %36 = arith.select %34, %23, %35 : vector<4x32xi1>, vector<4x32xf32>
    %37 = vector.extract_strided_slice %8 {offsets = [0, 2], sizes = [4, 32], strides = [1, 1]} : vector<4x39xf32> to vector<4x32xf32>
    %c-1_i32 = arith.constant -1 : i32
    %38 = vector.broadcast %c-1_i32 : i32 to vector<1x32xi32>
    %39 = arith.addi %5, %38 : vector<1x32xi32>
    %c0_i32_13 = arith.constant 0 : i32
    %40 = vector.broadcast %c0_i32_13 : i32 to vector<1x32xi32>
    %41 = arith.cmpi sge, %39, %40 : vector<1x32xi32>
    %c-1_i32_14 = arith.constant -1 : i32
    %42 = vector.broadcast %c-1_i32_14 : i32 to vector<1x32xi32>
    %43 = arith.addi %5, %42 : vector<1x32xi32>
    %c16_i32_15 = arith.constant 16 : i32
    %44 = vector.broadcast %c16_i32_15 : i32 to vector<1x32xi32>
    %45 = arith.cmpi slt, %43, %44 : vector<1x32xi32>
    %46 = arith.andi %41, %45 : vector<1x32xi1>
    %cst_16 = arith.constant 0.000000e+00 : f32
    %47 = vector.shape_cast %46 : vector<1x32xi1> to vector<1x32xi1>
    %48 = vector.broadcast %47 : vector<1x32xi1> to vector<4x32xi1>
    %49 = vector.broadcast %cst_16 : f32 to vector<4x32xf32>
    %50 = arith.select %48, %37, %49 : vector<4x32xi1>, vector<4x32xf32>
    %51 = vector.extract_strided_slice %8 {offsets = [0, 3], sizes = [4, 32], strides = [1, 1]} : vector<4x39xf32> to vector<4x32xf32>
    %c0_i32_17 = arith.constant 0 : i32
    %52 = vector.broadcast %c0_i32_17 : i32 to vector<1x32xi32>
    %53 = arith.addi %5, %52 : vector<1x32xi32>
    %c0_i32_18 = arith.constant 0 : i32
    %54 = vector.broadcast %c0_i32_18 : i32 to vector<1x32xi32>
    %55 = arith.cmpi sge, %53, %54 : vector<1x32xi32>
    %c0_i32_19 = arith.constant 0 : i32
    %56 = vector.broadcast %c0_i32_19 : i32 to vector<1x32xi32>
    %57 = arith.addi %5, %56 : vector<1x32xi32>
    %c16_i32_20 = arith.constant 16 : i32
    %58 = vector.broadcast %c16_i32_20 : i32 to vector<1x32xi32>
    %59 = arith.cmpi slt, %57, %58 : vector<1x32xi32>
    %60 = arith.andi %55, %59 : vector<1x32xi1>
    %cst_21 = arith.constant 0.000000e+00 : f32
    %61 = vector.shape_cast %60 : vector<1x32xi1> to vector<1x32xi1>
    %62 = vector.broadcast %61 : vector<1x32xi1> to vector<4x32xi1>
    %63 = vector.broadcast %cst_21 : f32 to vector<4x32xf32>
    %64 = arith.select %62, %51, %63 : vector<4x32xi1>, vector<4x32xf32>
    %65 = vector.extract_strided_slice %8 {offsets = [0, 4], sizes = [4, 32], strides = [1, 1]} : vector<4x39xf32> to vector<4x32xf32>
    %c1_i32 = arith.constant 1 : i32
    %66 = vector.broadcast %c1_i32 : i32 to vector<1x32xi32>
    %67 = arith.addi %5, %66 : vector<1x32xi32>
    %c0_i32_22 = arith.constant 0 : i32
    %68 = vector.broadcast %c0_i32_22 : i32 to vector<1x32xi32>
    %69 = arith.cmpi sge, %67, %68 : vector<1x32xi32>
    %c1_i32_23 = arith.constant 1 : i32
    %70 = vector.broadcast %c1_i32_23 : i32 to vector<1x32xi32>
    %71 = arith.addi %5, %70 : vector<1x32xi32>
    %c16_i32_24 = arith.constant 16 : i32
    %72 = vector.broadcast %c16_i32_24 : i32 to vector<1x32xi32>
    %73 = arith.cmpi slt, %71, %72 : vector<1x32xi32>
    %74 = arith.andi %69, %73 : vector<1x32xi1>
    %cst_25 = arith.constant 0.000000e+00 : f32
    %75 = vector.shape_cast %74 : vector<1x32xi1> to vector<1x32xi1>
    %76 = vector.broadcast %75 : vector<1x32xi1> to vector<4x32xi1>
    %77 = vector.broadcast %cst_25 : f32 to vector<4x32xf32>
    %78 = arith.select %76, %65, %77 : vector<4x32xi1>, vector<4x32xf32>
    %79 = vector.extract_strided_slice %8 {offsets = [0, 5], sizes = [4, 32], strides = [1, 1]} : vector<4x39xf32> to vector<4x32xf32>
    %c2_i32 = arith.constant 2 : i32
    %80 = vector.broadcast %c2_i32 : i32 to vector<1x32xi32>
    %81 = arith.addi %5, %80 : vector<1x32xi32>
    %c0_i32_26 = arith.constant 0 : i32
    %82 = vector.broadcast %c0_i32_26 : i32 to vector<1x32xi32>
    %83 = arith.cmpi sge, %81, %82 : vector<1x32xi32>
    %c2_i32_27 = arith.constant 2 : i32
    %84 = vector.broadcast %c2_i32_27 : i32 to vector<1x32xi32>
    %85 = arith.addi %5, %84 : vector<1x32xi32>
    %c16_i32_28 = arith.constant 16 : i32
    %86 = vector.broadcast %c16_i32_28 : i32 to vector<1x32xi32>
    %87 = arith.cmpi slt, %85, %86 : vector<1x32xi32>
    %88 = arith.andi %83, %87 : vector<1x32xi1>
    %cst_29 = arith.constant 0.000000e+00 : f32
    %89 = vector.shape_cast %88 : vector<1x32xi1> to vector<1x32xi1>
    %90 = vector.broadcast %89 : vector<1x32xi1> to vector<4x32xi1>
    %91 = vector.broadcast %cst_29 : f32 to vector<4x32xf32>
    %92 = arith.select %90, %79, %91 : vector<4x32xi1>, vector<4x32xf32>
    %93 = vector.extract_strided_slice %8 {offsets = [0, 6], sizes = [4, 32], strides = [1, 1]} : vector<4x39xf32> to vector<4x32xf32>
    %c3_i32 = arith.constant 3 : i32
    %94 = vector.broadcast %c3_i32 : i32 to vector<1x32xi32>
    %95 = arith.addi %5, %94 : vector<1x32xi32>
    %c0_i32_30 = arith.constant 0 : i32
    %96 = vector.broadcast %c0_i32_30 : i32 to vector<1x32xi32>
    %97 = arith.cmpi sge, %95, %96 : vector<1x32xi32>
    %c3_i32_31 = arith.constant 3 : i32
    %98 = vector.broadcast %c3_i32_31 : i32 to vector<1x32xi32>
    %99 = arith.addi %5, %98 : vector<1x32xi32>
    %c16_i32_32 = arith.constant 16 : i32
    %100 = vector.broadcast %c16_i32_32 : i32 to vector<1x32xi32>
    %101 = arith.cmpi slt, %99, %100 : vector<1x32xi32>
    %102 = arith.andi %97, %101 : vector<1x32xi1>
    %cst_33 = arith.constant 0.000000e+00 : f32
    %103 = vector.shape_cast %102 : vector<1x32xi1> to vector<1x32xi1>
    %104 = vector.broadcast %103 : vector<1x32xi1> to vector<4x32xi1>
    %105 = vector.broadcast %cst_33 : f32 to vector<4x32xf32>
    %106 = arith.select %104, %93, %105 : vector<4x32xi1>, vector<4x32xf32>
    %107 = vector.extract_strided_slice %8 {offsets = [0, 7], sizes = [4, 32], strides = [1, 1]} : vector<4x39xf32> to vector<4x32xf32>
    %c4_i32 = arith.constant 4 : i32
    %108 = vector.broadcast %c4_i32 : i32 to vector<1x32xi32>
    %109 = arith.addi %5, %108 : vector<1x32xi32>
    %c0_i32_34 = arith.constant 0 : i32
    %110 = vector.broadcast %c0_i32_34 : i32 to vector<1x32xi32>
    %111 = arith.cmpi sge, %109, %110 : vector<1x32xi32>
    %c4_i32_35 = arith.constant 4 : i32
    %112 = vector.broadcast %c4_i32_35 : i32 to vector<1x32xi32>
    %113 = arith.addi %5, %112 : vector<1x32xi32>
    %c16_i32_36 = arith.constant 16 : i32
    %114 = vector.broadcast %c16_i32_36 : i32 to vector<1x32xi32>
    %115 = arith.cmpi slt, %113, %114 : vector<1x32xi32>
    %116 = arith.andi %111, %115 : vector<1x32xi1>
    %cst_37 = arith.constant 0.000000e+00 : f32
    %117 = vector.shape_cast %116 : vector<1x32xi1> to vector<1x32xi1>
    %118 = vector.broadcast %117 : vector<1x32xi1> to vector<4x32xi1>
    %119 = vector.broadcast %cst_37 : f32 to vector<4x32xf32>
    %120 = arith.select %118, %107, %119 : vector<4x32xi1>, vector<4x32xf32>
    %121 = tpu.concatenate %22, %36, %50, %64, %78, %92, %106, %120 in 0 : vector<4x32xf32>, vector<4x32xf32>, vector<4x32xf32>, vector<4x32xf32>, vector<4x32xf32>, vector<4x32xf32>, vector<4x32xf32>, vector<4x32xf32> -> vector<32x32xf32>
    %c0_38 = arith.constant 0 : index
    %c0_39 = arith.constant 0 : index
    %122 = vector.load %arg2[%c0_38, %c0_39] : memref<8x32xbf16, #tpu.memory_space<vmem>>, vector<8x32xbf16>
    %123 = arith.truncf %121 : vector<32x32xf32> to vector<32x32xbf16>
    %cst_40 = arith.constant dense<0.000000e+00> : vector<8x32xf32>
    %124 = tpu.matmul %122, %123, %cst_40 {dimension_numbers = #tpu.dot_dimension_numbers<[1], [0], [0], [1], [0, 0, 1, 1], [], []>} : vector<8x32xbf16>, vector<32x32xbf16>, vector<8x32xf32> -> vector<8x32xf32>
    %cst_41 = arith.constant dense<0.000000e+00> : vector<8xf32>
    %125 = vector.multi_reduction <add>, %124, %cst_41 [1] : vector<8x32xf32> to vector<8xf32>
    %126 = vector.shape_cast %125 : vector<8xf32> to vector<8x1xf32>
    %cst_42 = arith.constant 3.125000e-02 : f32
    %127 = vector.broadcast %cst_42 : f32 to vector<8x1xf32>
    %128 = arith.mulf %126, %127 : vector<8x1xf32>
    %129 = arith.mulf %124, %124 : vector<8x32xf32>
    %cst_43 = arith.constant dense<0.000000e+00> : vector<8xf32>
    %130 = vector.multi_reduction <add>, %129, %cst_43 [1] : vector<8x32xf32> to vector<8xf32>
    %131 = vector.shape_cast %130 : vector<8xf32> to vector<8x1xf32>
    %cst_44 = arith.constant 3.125000e-02 : f32
    %132 = vector.broadcast %cst_44 : f32 to vector<8x1xf32>
    %133 = arith.mulf %131, %132 : vector<8x1xf32>
    %134 = arith.mulf %128, %128 : vector<8x1xf32>
    %135 = arith.subf %133, %134 : vector<8x1xf32>
    %cst_45 = arith.constant 0.000000e+00 : f32
    %136 = vector.broadcast %cst_45 : f32 to vector<8x1xf32>
    %137 = arith.maximumf %135, %136 : vector<8x1xf32>
    %cst_46 = arith.constant 9.99999974E-6 : f32
    %138 = vector.broadcast %cst_46 : f32 to vector<8x1xf32>
    %139 = arith.addf %137, %138 : vector<8x1xf32>
    %140 = math.rsqrt %139 : vector<8x1xf32>
    %c0_47 = arith.constant 0 : index
    %c0_48 = arith.constant 0 : index
    %141 = vector.load %arg3[%c0_47, %c0_48] : memref<8x1xf32, #tpu.memory_space<vmem>>, vector<8x1xf32>
    %142 = arith.mulf %140, %141 : vector<8x1xf32>
    %143 = vector.broadcast %128 : vector<8x1xf32> to vector<8x32xf32>
    %144 = arith.subf %124, %143 : vector<8x32xf32>
    %145 = vector.broadcast %142 : vector<8x1xf32> to vector<8x32xf32>
    %146 = arith.mulf %144, %145 : vector<8x32xf32>
    %c0_49 = arith.constant 0 : index
    %c0_50 = arith.constant 0 : index
    %147 = vector.load %arg4[%c0_49, %c0_50] : memref<8x1xf32, #tpu.memory_space<vmem>>, vector<8x1xf32>
    %148 = vector.broadcast %147 : vector<8x1xf32> to vector<8x32xf32>
    %149 = arith.addf %146, %148 : vector<8x32xf32>
    %cst_51 = arith.constant 0.000000e+00 : f32
    %150 = vector.broadcast %cst_51 : f32 to vector<8x32xf32>
    %151 = arith.maximumf %149, %150 : vector<8x32xf32>
    %cst_52 = arith.constant 0.000000e+00 : f32
    %152 = vector.broadcast %cst_52 : f32 to vector<8x2xf32>
    %cst_53 = arith.constant 0.000000e+00 : f32
    %153 = vector.broadcast %cst_53 : f32 to vector<8x2xf32>
    %154 = tpu.concatenate %152, %151, %153 in 1 : vector<8x2xf32>, vector<8x32xf32>, vector<8x2xf32> -> vector<8x36xf32>
    %155 = vector.extract_strided_slice %154 {offsets = [0, 0], sizes = [8, 32], strides = [1, 1]} : vector<8x36xf32> to vector<8x32xf32>
    %c-2_i32_54 = arith.constant -2 : i32
    %156 = vector.broadcast %c-2_i32_54 : i32 to vector<1x32xi32>
    %157 = arith.addi %5, %156 : vector<1x32xi32>
    %c0_i32_55 = arith.constant 0 : i32
    %158 = vector.broadcast %c0_i32_55 : i32 to vector<1x32xi32>
    %159 = arith.cmpi sge, %157, %158 : vector<1x32xi32>
    %c-2_i32_56 = arith.constant -2 : i32
    %160 = vector.broadcast %c-2_i32_56 : i32 to vector<1x32xi32>
    %161 = arith.addi %5, %160 : vector<1x32xi32>
    %c16_i32_57 = arith.constant 16 : i32
    %162 = vector.broadcast %c16_i32_57 : i32 to vector<1x32xi32>
    %163 = arith.cmpi slt, %161, %162 : vector<1x32xi32>
    %164 = arith.andi %159, %163 : vector<1x32xi1>
    %cst_58 = arith.constant 0.000000e+00 : f32
    %165 = vector.shape_cast %164 : vector<1x32xi1> to vector<1x32xi1>
    %166 = vector.broadcast %165 : vector<1x32xi1> to vector<8x32xi1>
    %167 = vector.broadcast %cst_58 : f32 to vector<8x32xf32>
    %168 = arith.select %166, %155, %167 : vector<8x32xi1>, vector<8x32xf32>
    %169 = vector.extract_strided_slice %154 {offsets = [0, 1], sizes = [8, 32], strides = [1, 1]} : vector<8x36xf32> to vector<8x32xf32>
    %c-1_i32_59 = arith.constant -1 : i32
    %170 = vector.broadcast %c-1_i32_59 : i32 to vector<1x32xi32>
    %171 = arith.addi %5, %170 : vector<1x32xi32>
    %c0_i32_60 = arith.constant 0 : i32
    %172 = vector.broadcast %c0_i32_60 : i32 to vector<1x32xi32>
    %173 = arith.cmpi sge, %171, %172 : vector<1x32xi32>
    %c-1_i32_61 = arith.constant -1 : i32
    %174 = vector.broadcast %c-1_i32_61 : i32 to vector<1x32xi32>
    %175 = arith.addi %5, %174 : vector<1x32xi32>
    %c16_i32_62 = arith.constant 16 : i32
    %176 = vector.broadcast %c16_i32_62 : i32 to vector<1x32xi32>
    %177 = arith.cmpi slt, %175, %176 : vector<1x32xi32>
    %178 = arith.andi %173, %177 : vector<1x32xi1>
    %cst_63 = arith.constant 0.000000e+00 : f32
    %179 = vector.shape_cast %178 : vector<1x32xi1> to vector<1x32xi1>
    %180 = vector.broadcast %179 : vector<1x32xi1> to vector<8x32xi1>
    %181 = vector.broadcast %cst_63 : f32 to vector<8x32xf32>
    %182 = arith.select %180, %169, %181 : vector<8x32xi1>, vector<8x32xf32>
    %183 = vector.extract_strided_slice %154 {offsets = [0, 2], sizes = [8, 32], strides = [1, 1]} : vector<8x36xf32> to vector<8x32xf32>
    %c0_i32_64 = arith.constant 0 : i32
    %184 = vector.broadcast %c0_i32_64 : i32 to vector<1x32xi32>
    %185 = arith.addi %5, %184 : vector<1x32xi32>
    %c0_i32_65 = arith.constant 0 : i32
    %186 = vector.broadcast %c0_i32_65 : i32 to vector<1x32xi32>
    %187 = arith.cmpi sge, %185, %186 : vector<1x32xi32>
    %c0_i32_66 = arith.constant 0 : i32
    %188 = vector.broadcast %c0_i32_66 : i32 to vector<1x32xi32>
    %189 = arith.addi %5, %188 : vector<1x32xi32>
    %c16_i32_67 = arith.constant 16 : i32
    %190 = vector.broadcast %c16_i32_67 : i32 to vector<1x32xi32>
    %191 = arith.cmpi slt, %189, %190 : vector<1x32xi32>
    %192 = arith.andi %187, %191 : vector<1x32xi1>
    %cst_68 = arith.constant 0.000000e+00 : f32
    %193 = vector.shape_cast %192 : vector<1x32xi1> to vector<1x32xi1>
    %194 = vector.broadcast %193 : vector<1x32xi1> to vector<8x32xi1>
    %195 = vector.broadcast %cst_68 : f32 to vector<8x32xf32>
    %196 = arith.select %194, %183, %195 : vector<8x32xi1>, vector<8x32xf32>
    %197 = vector.extract_strided_slice %154 {offsets = [0, 3], sizes = [8, 32], strides = [1, 1]} : vector<8x36xf32> to vector<8x32xf32>
    %c1_i32_69 = arith.constant 1 : i32
    %198 = vector.broadcast %c1_i32_69 : i32 to vector<1x32xi32>
    %199 = arith.addi %5, %198 : vector<1x32xi32>
    %c0_i32_70 = arith.constant 0 : i32
    %200 = vector.broadcast %c0_i32_70 : i32 to vector<1x32xi32>
    %201 = arith.cmpi sge, %199, %200 : vector<1x32xi32>
    %c1_i32_71 = arith.constant 1 : i32
    %202 = vector.broadcast %c1_i32_71 : i32 to vector<1x32xi32>
    %203 = arith.addi %5, %202 : vector<1x32xi32>
    %c16_i32_72 = arith.constant 16 : i32
    %204 = vector.broadcast %c16_i32_72 : i32 to vector<1x32xi32>
    %205 = arith.cmpi slt, %203, %204 : vector<1x32xi32>
    %206 = arith.andi %201, %205 : vector<1x32xi1>
    %cst_73 = arith.constant 0.000000e+00 : f32
    %207 = vector.shape_cast %206 : vector<1x32xi1> to vector<1x32xi1>
    %208 = vector.broadcast %207 : vector<1x32xi1> to vector<8x32xi1>
    %209 = vector.broadcast %cst_73 : f32 to vector<8x32xf32>
    %210 = arith.select %208, %197, %209 : vector<8x32xi1>, vector<8x32xf32>
    %211 = vector.extract_strided_slice %154 {offsets = [0, 4], sizes = [8, 32], strides = [1, 1]} : vector<8x36xf32> to vector<8x32xf32>
    %c2_i32_74 = arith.constant 2 : i32
    %212 = vector.broadcast %c2_i32_74 : i32 to vector<1x32xi32>
    %213 = arith.addi %5, %212 : vector<1x32xi32>
    %c0_i32_75 = arith.constant 0 : i32
    %214 = vector.broadcast %c0_i32_75 : i32 to vector<1x32xi32>
    %215 = arith.cmpi sge, %213, %214 : vector<1x32xi32>
    %c2_i32_76 = arith.constant 2 : i32
    %216 = vector.broadcast %c2_i32_76 : i32 to vector<1x32xi32>
    %217 = arith.addi %5, %216 : vector<1x32xi32>
    %c16_i32_77 = arith.constant 16 : i32
    %218 = vector.broadcast %c16_i32_77 : i32 to vector<1x32xi32>
    %219 = arith.cmpi slt, %217, %218 : vector<1x32xi32>
    %220 = arith.andi %215, %219 : vector<1x32xi1>
    %cst_78 = arith.constant 0.000000e+00 : f32
    %221 = vector.shape_cast %220 : vector<1x32xi1> to vector<1x32xi1>
    %222 = vector.broadcast %221 : vector<1x32xi1> to vector<8x32xi1>
    %223 = vector.broadcast %cst_78 : f32 to vector<8x32xf32>
    %224 = arith.select %222, %211, %223 : vector<8x32xi1>, vector<8x32xf32>
    %225 = tpu.concatenate %168, %182, %196, %210, %224 in 0 : vector<8x32xf32>, vector<8x32xf32>, vector<8x32xf32>, vector<8x32xf32>, vector<8x32xf32> -> vector<40x32xf32>
    %c0_79 = arith.constant 0 : index
    %c0_80 = arith.constant 0 : index
    %226 = vector.load %arg5[%c0_79, %c0_80] : memref<8x40xbf16, #tpu.memory_space<vmem>>, vector<8x40xbf16>
    %227 = arith.truncf %225 : vector<40x32xf32> to vector<40x32xbf16>
    %cst_81 = arith.constant dense<0.000000e+00> : vector<8x32xf32>
    %228 = tpu.matmul %226, %227, %cst_81 {dimension_numbers = #tpu.dot_dimension_numbers<[1], [0], [0], [1], [0, 0, 1, 1], [], []>} : vector<8x40xbf16>, vector<40x32xbf16>, vector<8x32xf32> -> vector<8x32xf32>
    %cst_82 = arith.constant dense<0.000000e+00> : vector<8xf32>
    %229 = vector.multi_reduction <add>, %228, %cst_82 [1] : vector<8x32xf32> to vector<8xf32>
    %230 = vector.shape_cast %229 : vector<8xf32> to vector<8x1xf32>
    %cst_83 = arith.constant 3.125000e-02 : f32
    %231 = vector.broadcast %cst_83 : f32 to vector<8x1xf32>
    %232 = arith.mulf %230, %231 : vector<8x1xf32>
    %233 = arith.mulf %228, %228 : vector<8x32xf32>
    %cst_84 = arith.constant dense<0.000000e+00> : vector<8xf32>
    %234 = vector.multi_reduction <add>, %233, %cst_84 [1] : vector<8x32xf32> to vector<8xf32>
    %235 = vector.shape_cast %234 : vector<8xf32> to vector<8x1xf32>
    %cst_85 = arith.constant 3.125000e-02 : f32
    %236 = vector.broadcast %cst_85 : f32 to vector<8x1xf32>
    %237 = arith.mulf %235, %236 : vector<8x1xf32>
    %238 = arith.mulf %232, %232 : vector<8x1xf32>
    %239 = arith.subf %237, %238 : vector<8x1xf32>
    %cst_86 = arith.constant 0.000000e+00 : f32
    %240 = vector.broadcast %cst_86 : f32 to vector<8x1xf32>
    %241 = arith.maximumf %239, %240 : vector<8x1xf32>
    %cst_87 = arith.constant 9.99999974E-6 : f32
    %242 = vector.broadcast %cst_87 : f32 to vector<8x1xf32>
    %243 = arith.addf %241, %242 : vector<8x1xf32>
    %244 = math.rsqrt %243 : vector<8x1xf32>
    %c0_88 = arith.constant 0 : index
    %c0_89 = arith.constant 0 : index
    %245 = vector.load %arg6[%c0_88, %c0_89] : memref<8x1xf32, #tpu.memory_space<vmem>>, vector<8x1xf32>
    %246 = arith.mulf %244, %245 : vector<8x1xf32>
    %247 = vector.broadcast %232 : vector<8x1xf32> to vector<8x32xf32>
    %248 = arith.subf %228, %247 : vector<8x32xf32>
    %249 = vector.broadcast %246 : vector<8x1xf32> to vector<8x32xf32>
    %250 = arith.mulf %248, %249 : vector<8x32xf32>
    %c0_90 = arith.constant 0 : index
    %c0_91 = arith.constant 0 : index
    %251 = vector.load %arg7[%c0_90, %c0_91] : memref<8x1xf32, #tpu.memory_space<vmem>>, vector<8x1xf32>
    %252 = vector.broadcast %251 : vector<8x1xf32> to vector<8x32xf32>
    %253 = arith.addf %250, %252 : vector<8x32xf32>
    %cst_92 = arith.constant 0.000000e+00 : f32
    %254 = vector.broadcast %cst_92 : f32 to vector<8x32xf32>
    %255 = arith.maximumf %253, %254 : vector<8x32xf32>
    %cst_93 = arith.constant 0.000000e+00 : f32
    %256 = vector.broadcast %cst_93 : f32 to vector<8x1xf32>
    %cst_94 = arith.constant 0.000000e+00 : f32
    %257 = vector.broadcast %cst_94 : f32 to vector<8x1xf32>
    %258 = tpu.concatenate %256, %255, %257 in 1 : vector<8x1xf32>, vector<8x32xf32>, vector<8x1xf32> -> vector<8x34xf32>
    %259 = vector.extract_strided_slice %258 {offsets = [0, 0], sizes = [8, 32], strides = [1, 1]} : vector<8x34xf32> to vector<8x32xf32>
    %c-1_i32_95 = arith.constant -1 : i32
    %260 = vector.broadcast %c-1_i32_95 : i32 to vector<1x32xi32>
    %261 = arith.addi %5, %260 : vector<1x32xi32>
    %c0_i32_96 = arith.constant 0 : i32
    %262 = vector.broadcast %c0_i32_96 : i32 to vector<1x32xi32>
    %263 = arith.cmpi sge, %261, %262 : vector<1x32xi32>
    %c-1_i32_97 = arith.constant -1 : i32
    %264 = vector.broadcast %c-1_i32_97 : i32 to vector<1x32xi32>
    %265 = arith.addi %5, %264 : vector<1x32xi32>
    %c16_i32_98 = arith.constant 16 : i32
    %266 = vector.broadcast %c16_i32_98 : i32 to vector<1x32xi32>
    %267 = arith.cmpi slt, %265, %266 : vector<1x32xi32>
    %268 = arith.andi %263, %267 : vector<1x32xi1>
    %cst_99 = arith.constant 0.000000e+00 : f32
    %269 = vector.shape_cast %268 : vector<1x32xi1> to vector<1x32xi1>
    %270 = vector.broadcast %269 : vector<1x32xi1> to vector<8x32xi1>
    %271 = vector.broadcast %cst_99 : f32 to vector<8x32xf32>
    %272 = arith.select %270, %259, %271 : vector<8x32xi1>, vector<8x32xf32>
    %273 = vector.extract_strided_slice %258 {offsets = [0, 1], sizes = [8, 32], strides = [1, 1]} : vector<8x34xf32> to vector<8x32xf32>
    %c0_i32_100 = arith.constant 0 : i32
    %274 = vector.broadcast %c0_i32_100 : i32 to vector<1x32xi32>
    %275 = arith.addi %5, %274 : vector<1x32xi32>
    %c0_i32_101 = arith.constant 0 : i32
    %276 = vector.broadcast %c0_i32_101 : i32 to vector<1x32xi32>
    %277 = arith.cmpi sge, %275, %276 : vector<1x32xi32>
    %c0_i32_102 = arith.constant 0 : i32
    %278 = vector.broadcast %c0_i32_102 : i32 to vector<1x32xi32>
    %279 = arith.addi %5, %278 : vector<1x32xi32>
    %c16_i32_103 = arith.constant 16 : i32
    %280 = vector.broadcast %c16_i32_103 : i32 to vector<1x32xi32>
    %281 = arith.cmpi slt, %279, %280 : vector<1x32xi32>
    %282 = arith.andi %277, %281 : vector<1x32xi1>
    %cst_104 = arith.constant 0.000000e+00 : f32
    %283 = vector.shape_cast %282 : vector<1x32xi1> to vector<1x32xi1>
    %284 = vector.broadcast %283 : vector<1x32xi1> to vector<8x32xi1>
    %285 = vector.broadcast %cst_104 : f32 to vector<8x32xf32>
    %286 = arith.select %284, %273, %285 : vector<8x32xi1>, vector<8x32xf32>
    %287 = vector.extract_strided_slice %258 {offsets = [0, 2], sizes = [8, 32], strides = [1, 1]} : vector<8x34xf32> to vector<8x32xf32>
    %c1_i32_105 = arith.constant 1 : i32
    %288 = vector.broadcast %c1_i32_105 : i32 to vector<1x32xi32>
    %289 = arith.addi %5, %288 : vector<1x32xi32>
    %c0_i32_106 = arith.constant 0 : i32
    %290 = vector.broadcast %c0_i32_106 : i32 to vector<1x32xi32>
    %291 = arith.cmpi sge, %289, %290 : vector<1x32xi32>
    %c1_i32_107 = arith.constant 1 : i32
    %292 = vector.broadcast %c1_i32_107 : i32 to vector<1x32xi32>
    %293 = arith.addi %5, %292 : vector<1x32xi32>
    %c16_i32_108 = arith.constant 16 : i32
    %294 = vector.broadcast %c16_i32_108 : i32 to vector<1x32xi32>
    %295 = arith.cmpi slt, %293, %294 : vector<1x32xi32>
    %296 = arith.andi %291, %295 : vector<1x32xi1>
    %cst_109 = arith.constant 0.000000e+00 : f32
    %297 = vector.shape_cast %296 : vector<1x32xi1> to vector<1x32xi1>
    %298 = vector.broadcast %297 : vector<1x32xi1> to vector<8x32xi1>
    %299 = vector.broadcast %cst_109 : f32 to vector<8x32xf32>
    %300 = arith.select %298, %287, %299 : vector<8x32xi1>, vector<8x32xf32>
    %301 = tpu.concatenate %272, %286, %300 in 0 : vector<8x32xf32>, vector<8x32xf32>, vector<8x32xf32> -> vector<24x32xf32>
    %c0_110 = arith.constant 0 : index
    %c0_111 = arith.constant 0 : index
    %302 = vector.load %arg8[%c0_110, %c0_111] : memref<16x24xbf16, #tpu.memory_space<vmem>>, vector<16x24xbf16>
    %303 = arith.truncf %301 : vector<24x32xf32> to vector<24x32xbf16>
    %cst_112 = arith.constant dense<0.000000e+00> : vector<16x32xf32>
    %304 = tpu.matmul %302, %303, %cst_112 {dimension_numbers = #tpu.dot_dimension_numbers<[1], [0], [0], [1], [0, 0, 1, 1], [], []>} : vector<16x24xbf16>, vector<24x32xbf16>, vector<16x32xf32> -> vector<16x32xf32>
    %cst_113 = arith.constant dense<0.000000e+00> : vector<16xf32>
    %305 = vector.multi_reduction <add>, %304, %cst_113 [1] : vector<16x32xf32> to vector<16xf32>
    %306 = vector.shape_cast %305 : vector<16xf32> to vector<16x1xf32>
    %cst_114 = arith.constant 3.125000e-02 : f32
    %307 = vector.broadcast %cst_114 : f32 to vector<16x1xf32>
    %308 = arith.mulf %306, %307 : vector<16x1xf32>
    %309 = arith.mulf %304, %304 : vector<16x32xf32>
    %cst_115 = arith.constant dense<0.000000e+00> : vector<16xf32>
    %310 = vector.multi_reduction <add>, %309, %cst_115 [1] : vector<16x32xf32> to vector<16xf32>
    %311 = vector.shape_cast %310 : vector<16xf32> to vector<16x1xf32>
    %cst_116 = arith.constant 3.125000e-02 : f32
    %312 = vector.broadcast %cst_116 : f32 to vector<16x1xf32>
    %313 = arith.mulf %311, %312 : vector<16x1xf32>
    %314 = arith.mulf %308, %308 : vector<16x1xf32>
    %315 = arith.subf %313, %314 : vector<16x1xf32>
    %cst_117 = arith.constant 0.000000e+00 : f32
    %316 = vector.broadcast %cst_117 : f32 to vector<16x1xf32>
    %317 = arith.maximumf %315, %316 : vector<16x1xf32>
    %cst_118 = arith.constant 9.99999974E-6 : f32
    %318 = vector.broadcast %cst_118 : f32 to vector<16x1xf32>
    %319 = arith.addf %317, %318 : vector<16x1xf32>
    %320 = math.rsqrt %319 : vector<16x1xf32>
    %c0_119 = arith.constant 0 : index
    %c0_120 = arith.constant 0 : index
    %321 = vector.load %arg9[%c0_119, %c0_120] : memref<16x1xf32, #tpu.memory_space<vmem>>, vector<16x1xf32>
    %322 = arith.mulf %320, %321 : vector<16x1xf32>
    %323 = vector.broadcast %308 : vector<16x1xf32> to vector<16x32xf32>
    %324 = arith.subf %304, %323 : vector<16x32xf32>
    %325 = vector.broadcast %322 : vector<16x1xf32> to vector<16x32xf32>
    %326 = arith.mulf %324, %325 : vector<16x32xf32>
    %c0_121 = arith.constant 0 : index
    %c0_122 = arith.constant 0 : index
    %327 = vector.load %arg10[%c0_121, %c0_122] : memref<16x1xf32, #tpu.memory_space<vmem>>, vector<16x1xf32>
    %328 = vector.broadcast %327 : vector<16x1xf32> to vector<16x32xf32>
    %329 = arith.addf %326, %328 : vector<16x32xf32>
    %c0_123 = arith.constant 0 : index
    %c0_124 = arith.constant 0 : index
    %330 = vector.load %arg11[%c0_123, %c0_124] : memref<16x4xbf16, #tpu.memory_space<vmem>>, vector<16x4xbf16>
    %331 = arith.truncf %4 : vector<4x32xf32> to vector<4x32xbf16>
    %cst_125 = arith.constant dense<0.000000e+00> : vector<16x32xf32>
    %332 = tpu.matmul %330, %331, %cst_125 {dimension_numbers = #tpu.dot_dimension_numbers<[1], [0], [0], [1], [0, 0, 1, 1], [], []>} : vector<16x4xbf16>, vector<4x32xbf16>, vector<16x32xf32> -> vector<16x32xf32>
    %cst_126 = arith.constant dense<0.000000e+00> : vector<16xf32>
    %333 = vector.multi_reduction <add>, %332, %cst_126 [1] : vector<16x32xf32> to vector<16xf32>
    %334 = vector.shape_cast %333 : vector<16xf32> to vector<16x1xf32>
    %cst_127 = arith.constant 3.125000e-02 : f32
    %335 = vector.broadcast %cst_127 : f32 to vector<16x1xf32>
    %336 = arith.mulf %334, %335 : vector<16x1xf32>
    %337 = arith.mulf %332, %332 : vector<16x32xf32>
    %cst_128 = arith.constant dense<0.000000e+00> : vector<16xf32>
    %338 = vector.multi_reduction <add>, %337, %cst_128 [1] : vector<16x32xf32> to vector<16xf32>
    %339 = vector.shape_cast %338 : vector<16xf32> to vector<16x1xf32>
    %cst_129 = arith.constant 3.125000e-02 : f32
    %340 = vector.broadcast %cst_129 : f32 to vector<16x1xf32>
    %341 = arith.mulf %339, %340 : vector<16x1xf32>
    %342 = arith.mulf %336, %336 : vector<16x1xf32>
    %343 = arith.subf %341, %342 : vector<16x1xf32>
    %cst_130 = arith.constant 0.000000e+00 : f32
    %344 = vector.broadcast %cst_130 : f32 to vector<16x1xf32>
    %345 = arith.maximumf %343, %344 : vector<16x1xf32>
    %cst_131 = arith.constant 9.99999974E-6 : f32
    %346 = vector.broadcast %cst_131 : f32 to vector<16x1xf32>
    %347 = arith.addf %345, %346 : vector<16x1xf32>
    %348 = math.rsqrt %347 : vector<16x1xf32>
    %c0_132 = arith.constant 0 : index
    %c0_133 = arith.constant 0 : index
    %349 = vector.load %arg12[%c0_132, %c0_133] : memref<16x1xf32, #tpu.memory_space<vmem>>, vector<16x1xf32>
    %350 = arith.mulf %348, %349 : vector<16x1xf32>
    %351 = vector.broadcast %336 : vector<16x1xf32> to vector<16x32xf32>
    %352 = arith.subf %332, %351 : vector<16x32xf32>
    %353 = vector.broadcast %350 : vector<16x1xf32> to vector<16x32xf32>
    %354 = arith.mulf %352, %353 : vector<16x32xf32>
    %c0_134 = arith.constant 0 : index
    %c0_135 = arith.constant 0 : index
    %355 = vector.load %arg13[%c0_134, %c0_135] : memref<16x1xf32, #tpu.memory_space<vmem>>, vector<16x1xf32>
    %356 = vector.broadcast %355 : vector<16x1xf32> to vector<16x32xf32>
    %357 = arith.addf %354, %356 : vector<16x32xf32>
    %358 = arith.addf %329, %357 : vector<16x32xf32>
    %cst_136 = arith.constant 0.000000e+00 : f32
    %359 = vector.broadcast %cst_136 : f32 to vector<16x32xf32>
    %360 = arith.maximumf %358, %359 : vector<16x32xf32>
    %361 = vector.extract_strided_slice %360 {offsets = [0, 0], sizes = [16, 16], strides = [1, 1]} : vector<16x32xf32> to vector<16x16xf32>
    %c0_137 = arith.constant 0 : index
    %c0_138 = arith.constant 0 : index
    %c0_139 = arith.constant 0 : index
    %362 = vector.load %arg14[%c0_137, %c0_138, %c0_139] : memref<2x16x16xf32, #tpu.memory_space<vmem>>, vector<1x16x16xf32>
    %363 = vector.shape_cast %362 : vector<1x16x16xf32> to vector<16x16xf32>
    %364 = vector.shape_cast %361 : vector<16x16xf32> to vector<1x16x16xf32>
    tpu.vector_store %arg14[%c0_137, %c0_138, %c0_139], %364 {strides = array<i32>} : memref<2x16x16xf32, #tpu.memory_space<vmem>>, vector<1x16x16xf32>,
    %365 = vector.extract_strided_slice %360 {offsets = [0, 16], sizes = [16, 16], strides = [1, 1]} : vector<16x32xf32> to vector<16x16xf32>
    %c1_140 = arith.constant 1 : index
    %c0_141 = arith.constant 0 : index
    %c0_142 = arith.constant 0 : index
    %366 = vector.load %arg14[%c1_140, %c0_141, %c0_142] : memref<2x16x16xf32, #tpu.memory_space<vmem>>, vector<1x16x16xf32>
    %367 = vector.shape_cast %366 : vector<1x16x16xf32> to vector<16x16xf32>
    %368 = vector.shape_cast %365 : vector<16x16xf32> to vector<1x16x16xf32>
    tpu.vector_store %arg14[%c1_140, %c0_141, %c0_142], %368 {strides = array<i32>} : memref<2x16x16xf32, #tpu.memory_space<vmem>>, vector<1x16x16xf32>,
    return
  }
}

</mosaic_0001>

<bundles_post_ra>
// kernel: tpu_custom_call.1
= control target key start
LH: loop header
LB: loop body
LE: loop exit
PB: predicated region body
PF: predicated region fallthrough
CT: control target
= control target key end

     0   :  { %s782_s15 = smov 16   ;;  %s1127_s0 = inlined_call_operand.vmem [shape: f32[2,4,16], index: 0, kind: input, shape index: {}]   ;;  %s1128_s1 = inlined_call_operand.vmem [shape: s32[1,32], index: 1, kind: input, shape index: {}]   ;;  %s1129_s2 = inlined_call_operand.vmem [shape: bf16[8,32], index: 2, kind: input, shape index: {}]   ;;  %s1130_s3 = inlined_call_operand.vmem [shape: f32[8,1], index: 3, kind: input, shape index: {}]   ;;  %s1131_s4 = inlined_call_operand.vmem [shape: f32[8,1], index: 4, kind: input, shape index: {}]   ;;  %s1132_s5 = inlined_call_operand.vmem [shape: bf16[8,40], index: 5, kind: input, shape index: {}]   ;;  %s1133_s6 = inlined_call_operand.vmem [shape: f32[8,1], index: 6, kind: input, shape index: {}]   ;;  %s1134_s7 = inlined_call_operand.vmem [shape: f32[8,1], index: 7, kind: input, shape index: {}]   ;;  %s1135_s8 = inlined_call_operand.vmem [shape: bf16[16,24], index: 8, kind: input, shape index: {}]   ;;  %s1136_s9 = inlined_call_operand.vmem [shape: f32[16,1], index: 9, kind: input, shape index: {}]   ;;  %s1137_s10 = inlined_call_operand.vmem [shape: f32[16,1], index: 10, kind: input, shape index: {}]   ;;  %s1138_s11 = inlined_call_operand.vmem [shape: bf16[16,4], index: 11, kind: input, shape index: {}]   ;;  %s1139_s12 = inlined_call_operand.vmem [shape: f32[16,1], index: 12, kind: input, shape index: {}]   ;;  %s1140_s13 = inlined_call_operand.vmem [shape: f32[16,1], index: 13, kind: input, shape index: {}]   ;;  %s1141_s14 = inlined_call_operand.hbm [shape: f32[2,16,16], index: 14, kind: output, shape index: {}]  }
   0x1   :  { %v664_v0 = vld [vmem:[%s1127_s0 + $0x4] sm:$0xf] }
   0x2   :  { %53 = vrot.lane.b32.xlu0 %v664_v0, %s782_s15 }
   0x3   :  { %19 = vsyncpa [#allocation3], 0  ;;  %v783_v1 = vmov 0   ;;  %v49_v2 = vld [vmem:[%s1127_s0] sm:$0xf]  ;;  %vm1142_vm0 = vcmask 130048   ;;  %v72_v11 = vlaneseq }
   0x4   :  { %742 = vset.pattern.permute.xlu0 %v783_v1  ;;  %743 = vset.pattern.permute.xlu1 %v783_v1  ;;  %s784_s18 = smov 3   ;;  %vm63_vm1 = vcmask 23552   ;;  %vm65_vm2 = vcmask 285696   ;;  %v785_v5 = vmov 0.0   ;;  %s786_s0 = smov 126   ;;  %vm1143_vm3 = vmmov 0  }
   0x5   :  { %692 = vmatprep.subr.bf16.mxu0 %v785_v5  ;;  %700 = vmatprep.subr.bf16.mxu1 %v785_v5  ;;  %s787_s19 = smov 127   ;;  %s788_s20 = smov 121   ;;  %v58_v9 = vld [vmem:[%s1128_s1] sm:$0x1]  ;;  %v73_v14 = vshrl.u32 %v72_v11, 7 }
   0x6   :  { %s789_s21 = smov 125   ;;  %696 = vmatprep.mubr.msk.bf16.mxu0 %vm1143_vm3, %v785_v5  ;;  %706 = vmatprep.mubr.msk.bf16.mxu1 %vm1143_vm3, %v785_v5  ;;  %s791_s22 = smov 122   ;;  %v78_v10 = vadd.s32 4294967294, %v58_v9  ;;  %v67_v12 = vadd.s32 4294967293, %v58_v9  ;;  %v93_v13 = vadd.s32 4294967295, %v58_v9  ;;  %v162_v15 = vadd.s32 4, %v58_v9 }
   0x7   :  { %s792_s23 = smov 123   ;;  %s793_s24 = smov 124   ;;  %vm107_vm7 = vcmp.ge.s32.totalorder %v58_v9, 0  ;;  %vm108_vm8 = vcmp.lt.s32.totalorder %v58_v9, 16  ;;  %v134_v16 = vadd.s32 2, %v58_v9  ;;  %v148_v18 = vadd.s32 3, %v58_v9 }
   0x8   :  { %vm79_vm4 = vcmp.ge.s32.totalorder %v78_v10, 0  ;;  %vm80_vm5 = vcmp.lt.s32.totalorder %v78_v10, 16  ;;  %vm68_vm9 = vcmp.ge.s32.totalorder %v67_v12, 0  ;;  %vm69_vm10 = vcmp.lt.s32.totalorder %v67_v12, 16  ;;  %vm109_vm15 = vmand %vm107_vm7, %vm108_vm8 }
   0x9   :  { %vm81_vm6 = vmand %vm79_vm4, %vm80_vm5  ;;  %vm94_vm11 = vcmp.ge.s32.totalorder %v93_v13, 0  ;;  %vm95_vm12 = vcmp.lt.s32.totalorder %v93_v13, 16  ;;  %v74_v19 = vsub.s32 0, %v73_v14  ;;  %vm163_vm13 = vcmp.ge.s32.totalorder %v162_v15, 0  ;;  %v263_v14 = vld [vmem:[%s1131_s4] sm:$0xff]  ;;  %s794_s4 = smov 2  }
   0xa   :  { %v82_v17 = vsel %vm81_vm6, 1, %v783_v1  ;;  %vm164_vm14 = vcmp.lt.s32.totalorder %v162_v15, 16  ;;  %v120_v20 = vadd.s32 1, %v58_v9  ;;  %vm96_vm4 = vmand %vm94_vm11, %vm95_vm12  ;;  %v110_v22 = vsel %vm109_vm15, 1, %v783_v1 }
   0xb   :  { %v86_v21 = vrot.slane %v82_v17, %v74_v19  ;;  %vm165_vm5 = vmand %vm163_vm13, %vm164_vm14  ;;  %vm149_vm3 = vcmp.ge.s32.totalorder %v148_v18, 0  ;;  %vm150_vm6 = vcmp.lt.s32.totalorder %v148_v18, 16  ;;  %v97_v23 = vsel %vm96_vm4, 1, %v783_v1 }
   0xc   :  { %vm121_vm8 = vcmp.ge.s32.totalorder %v120_v20, 0  ;;  %v114_v26 = vrot.slane %v110_v22, %v74_v19  ;;  %vm151_vm11 = vmand %vm149_vm3, %vm150_vm6  ;;  %v166_v27 = vsel %vm165_vm5, 1, %v783_v1  ;;  %v101_v29 = vrot.slane %v97_v23, %v74_v19 }
   0xd   :  { %v152_v34 = vsel %vm151_vm11, 1, %v783_v1  ;;  %v170_v35 = vrot.slane %v166_v27, %v74_v19  ;;  %vm188_vm14 = vcmask 1043456   ;;  %vm196_vm5 = vcmask 261120  }
   0xe   :  { %vm927_vm3 = vcmp.eq.s32.totalorder %v101_v29, 1  ;;  %v156_v43 = vrot.slane %v152_v34, %v74_v19  ;;  %vm1159_vm6 = vmmov 0  }
   0xf   :  { %vm933_vm15 = vcmp.eq.s32.totalorder %v170_v35, 1 }
  0x74   :  { %v54_v3 = vpop.permute.xlu0 %53 }
  0x75   :  { %v884_v4 = vsel %vm1142_vm0, %v49_v2, %v54_v3  ;;  %vm70_vm0 = vmand %vm68_vm9, %vm69_vm10  ;;  %vm122_vm9 = vcmp.lt.s32.totalorder %v120_v20, 16  ;;  %vm913_vm10 = vcmp.eq.s32.totalorder %v86_v21, 1 }
  0x76   :  { %60 = vrot.lane.b32.xlu0 %v884_v4, %s784_s18  ;;  %v71_v24 = vsel %vm70_vm0, 1, %v783_v1  ;;  %vm123_vm12 = vmand %vm121_vm8, %vm122_vm9  ;;  %vm922_vm0 = vcmp.eq.s32.totalorder %v114_v26, 1  ;;  %vm277_vm8 = vcmask 277504   ;;  %v516_v45 = vpack.c.bf16 %v884_v4, %v884_v4 }
  0x77   :  { %v75_v32 = vrot.slane %v71_v24, %v74_v19  ;;  %v124_v38 = vsel %vm123_vm12, 1, %v783_v1  ;;  %v254_v24 = vld [vmem:[%s1130_s3] sm:$0xff]  ;;  %vm666_vm9 = vmpackc.low %vm927_vm3, %vm913_vm10  ;;  %vm526_vm12 = vcmask 1041408  }
  0x78   :  { %v128_v48 = vrot.slane %v124_v38, %v74_v19 }
  0x79   :  { %vm76_vm13 = vcmp.eq.s32.totalorder %v75_v32, 1 }
  0x7a   :  { %vm954_vm4 = vcmp.eq.s32.totalorder %v128_v48, 1  ;;  %v297_v48 = vld [vmem:[%s1132_s5] sm:$0xf] }
  0x7b   :  { %vm669_vm11 = vmpackc.low %vm954_vm4, %vm922_vm0 }
  0xe8   :  { %v61_v6 = vpop.permute.xlu0 %60 }
  0xe9   :  { %v64_v7 = vsel %vm63_vm1, 0.0, %v61_v6  ;;  %vm135_vm1 = vcmp.ge.s32.totalorder %v134_v16, 0  ;;  %v193_v6 = vld [vmem:[%s1129_s2] sm:$0xf] }
  0xea   :  { %v889_v8 = vsel %vm65_vm2, %v64_v7, 0.0  ;;  %vm136_vm2 = vcmp.lt.s32.totalorder %v134_v16, 16 }
  0xeb   :  { %103 = vrot.lane.b32.xlu0 %v889_v8, %s786_s0  ;;  %89 = vrot.lane.b32.xlu1 %v889_v8, %s787_s19  ;;  %vm137_vm7 = vmand %vm135_vm1, %vm136_vm2  ;;  %v77_v50 = vsel %vm76_vm13, %v889_v8, 0.0  ;;  %vm944_vm2 = vcmp.eq.s32.totalorder %v156_v43, 1  ;;  %vm522_vm13 = vcmask 31744  }
  0xec   :  { %v138_v28 = vsel %vm137_vm7, 1, %v783_v1  ;;  %vm275_vm7 = vcmask 15360  }
  0xed   :  { %v142_v37 = vrot.slane %v138_v28, %v74_v19 }
  0xef   :  { %172 = vrot.lane.b32.xlu0 %v889_v8, %s788_s20  ;;  %116 = vrot.lane.b32.xlu1 %v889_v8, %s789_s21  ;;  %vm937_vm1 = vcmp.eq.s32.totalorder %v142_v37, 1 }
  0xf3   :  { %158 = vrot.lane.b32.xlu0 %v889_v8, %s791_s22  ;;  %144 = vrot.lane.b32.xlu1 %v889_v8, %s792_s23 }
  0xf7   :  { %130 = vrot.lane.b32.xlu1 %v889_v8, %s793_s24 }
 0x15d   :  { %v104_v30 = vpop.permute.xlu0 %103  ;;  %v90_v31 = vpop.permute.xlu1 %89 }
 0x15e   :  { %v92_v33 = vsel %vm913_vm10, %v90_v31, 0.0  ;;  %v106_v49 = vsel %vm927_vm3, %v104_v30, 0.0  ;;  %vm301_vm10 = vcmask 326656  }
 0x15f   :  { %v177_v40 = vrot.slane %v92_v33, 4 }
 0x161   :  { %v173_v41 = vpop.permute.xlu0 %172  ;;  %v117_v42 = vpop.permute.xlu1 %116  ;;  %v189_v54 = vsel %vm188_vm14, %v77_v50, %v177_v40 }
 0x162   :  { %v119_v44 = vsel %vm922_vm0, %v117_v42, 0.0  ;;  %v175_v56 = vsel %vm933_vm15, %v173_v41, 0.0  ;;  %vm383_vm15 = vcmask 7168  }
 0x163   :  { %v180_v46 = vrot.slane %v119_v44, 4  ;;  %v186_v61 = vrot.slane %v175_v56, 4 }
 0x165   :  { %v159_v52 = vpop.permute.xlu0 %158  ;;  %v145_v53 = vpop.permute.xlu1 %144  ;;  %v190_v55 = vsel %vm188_vm14, %v106_v49, %v180_v46  ;;  %v528_v49 = vsel %vm526_vm12, %v516_v45, 0 }
 0x166   :  { %v147_v57 = vsel %vm937_vm1, %v145_v53, 0.0  ;;  %v194_v58 = vpack.c.bf16 %v190_v55, %v189_v54  ;;  %v161_v60 = vsel %vm944_vm2, %v159_v52, 0.0  ;;  %v371_v55 = vld [vmem:[%s1134_s7] sm:$0xff]  ;;  %vm674_vm2 = vmpackc.low %vm922_vm0, %vm927_vm3  ;;  %vm1160_vm0 = vcmask 130048  }
 0x167   :  { %v183_v62 = vrot.slane %v147_v57, 4  ;;  %v192_v1 = vsel %vm188_vm14, %v161_v60, %v186_v61  ;;  %vm1161_vm3 = vmmov %vm1160_vm0 }
 0x168   :  { %693 = vmatpush3.bf16.msra.mxu0 %v194_v58 }
 0x169   :  { %v131_v63 = vpop.permute.xlu1 %130  ;;  %694 = vmatprep.subr.bf16.mxu0 %v785_v5 }
 0x16a   :  { %v133_v0 = vsel %vm954_vm4, %v131_v63, 0.0 }
 0x16b   :  { %v191_v2 = vsel %vm188_vm14, %v133_v0, %v183_v62 }
 0x16c   :  { %v195_v3 = vpack.c.bf16 %v192_v1, %v191_v2  ;;  %v362_v2 = vld [vmem:[%s1133_s6] sm:$0xff] }
 0x16e   :  { %695 = vmatpush3.bf16.msra.mxu0 %v195_v3 }
 0x16f   :  { %710 = vmatprep.subr.bf16.mxu0 %v785_v5 }
 0x171   :  { %697 = vmatmul.mubr.msk.bf16.vlgmr.msra.gmra.mrb[0].mxu0 %vm196_vm5, %v193_v6 }
 0x172   :  { %714 = vmatprep.mubr.msk.bf16.mxu0 %vm1159_vm6, %v785_v5 }
 0x244   :  { %v234_v7 = vpop.f32.mrb[0].mxu0 }
 0x245   :  { %v698_v8 = vpop.f32.mrb[1].mxu0  ;;  %v240_v9 = vsel %vm196_vm5, %v234_v7, 0.0  ;;  %v244_v10 = vmul.f32 %v234_v7, %v234_v7 }
 0x246   :  { %241 = vadd.xlane.f32.xlu1 %v240_v9  ;;  %v237_v11 = vpop.f32.mrb[2].mxu0 }
 0x247   :  { %v699_v12 = vpop.f32.mrb[3].mxu0  ;;  %v245_v13 = vsel %vm196_vm5, %v244_v10, 0.0 }
 0x248   :  { %246 = vadd.xlane.f32.xlu0 %v245_v13 }
 0x257   :  { %266 = vperm.xlu1 %743, %v263_v14  }
 0x2d3   :  { %v242_v15 = vpop.xlane.xlu1 %241 }
 0x2d4   :  { %v243_v16 = vmul.f32 0.03125, %v242_v15 }
 0x2d5   :  { %v247_v17 = vpop.xlane.xlu0 %246 }
 0x2d6   :  { %v249_v18 = vmul.f32 %v243_v16, %v243_v16  ;;  %v248_v19 = vmul.f32 0.03125, %v247_v17  ;;  %v256_v20 = vsub.f32 %v234_v7, %v243_v16  ;;  %v744_v7 = vld [vmem:[%s1138_s11] sm:$0xff]  }
 0x2d7   :  { %v267_v29 = vpop.permute.xlu1 %266 }
 0x2d8   :  { %v250_v21 = vsub.f32 %v248_v19, %v249_v18 }
 0x2da   :  { %v251_v22 = vmax.f32 %v250_v21, 0.0 }
 0x2dc   :  { %v252_v23 = vadd.f32 1e-05, %v251_v22 }
 0x2de   :  { %746 = vrsqrt.f32 %v252_v23 }
 0x2e8   :  { %v747_v26 = vpop.eup %746 }
 0x2e9   :  { %v255_v27 = vmul.f32 %v747_v26, %v254_v24 }
 0x2eb   :  { %259 = vperm.xlu0 %742, %v255_v27  }
 0x36a   :  { %v260_v28 = vpop.permute.xlu0 %259 }
 0x36b   :  { %v262_v30 = vmul.f32 %v260_v28, %v256_v20 }
 0x36d   :  { %v269_v31 = vadd.f32 %v267_v29, %v262_v30  ;;  %v745_v29 = vld [vmem:[%s1135_s8] sm:$0xff]  }
 0x36f   :  { %v270_v32 = vmax.f32 %v269_v31, 0.0 }
 0x371   :  { %272 = vrot.lane.b32.xlu1 %v270_v32, %s794_s4 }
 0x3e3   :  { %v273_v33 = vpop.permute.xlu1 %272 }
 0x3e4   :  { %v276_v34 = vsel %vm275_vm7, 0.0, %v273_v33 }
 0x3e5   :  { %v278_v35 = vsel %vm277_vm8, %v276_v34, 0.0 }
 0x3e6   :  { %281 = vrot.lane.b32.xlu1 %v278_v35, %s787_s19 }
 0x3ea   :  { %285 = vrot.lane.b32.xlu1 %v278_v35, %s786_s0 }
 0x3ee   :  { %289 = vrot.lane.b32.xlu1 %v278_v35, %s789_s21  ;;  %s795_s21 = smov 1  }
 0x3f2   :  { %293 = vrot.lane.b32.xlu1 %v278_v35, %s793_s24 }
 0x458   :  { %v282_v37 = vpop.permute.xlu1 %281 }
 0x459   :  { %v667_v38 = vpack.c.bf16 %v282_v37, %v278_v35 }
 0x45b   :  { %701 = vmatpush3.bf16.msk.msra.mxu1 %vm666_vm9, %v667_v38 }
 0x45c   :  { %v286_v40 = vpop.permute.xlu1 %285  ;;  %702 = vmatprep.subr.bf16.mxu1 %v785_v5 }
 0x460   :  { %v290_v41 = vpop.permute.xlu1 %289 }
 0x461   :  { %v670_v42 = vpack.c.bf16 %v290_v41, %v286_v40 }
 0x463   :  { %703 = vmatpush3.bf16.msk.msra.mxu1 %vm669_vm11, %v670_v42 }
 0x464   :  { %v294_v43 = vpop.permute.xlu1 %293  ;;  %704 = vmatprep.subr.bf16.mxu1 %v785_v5 }
 0x465   :  { %v296_v25 = vsel %vm937_vm1, %v294_v43, 0.0  ;;  %vm385_vm1 = vcmask 269312  }
 0x466   :  { %v300_v44 = vpack.c.bf16 %v296_v25, %v296_v25 }
 0x468   :  { %v306_v46 = vsel %vm188_vm14, %v300_v44, 0 }
 0x469   :  { %705 = vmatpush3.bf16.msra.mxu1 %v306_v46 }
 0x46a   :  { %718 = vmatprep.subr.bf16.mxu1 %v785_v5 }
 0x46c   :  { %707 = vmatmul.mubr.msk.bf16.vlgmr.msra.gmra.mrb[0].mxu1 %vm301_vm10, %v297_v48 }
 0x46d   :  { %719 = vmatpush3.bf16.msra.mxu1 %v528_v49  ;;  %720 = vmatprep.mubr.msk.bf16.mxu1 %vm1159_vm6, %v785_v5  ;;  %vm406_vm6 = vcmask 195584  }
 0x474   :  { %721 = vmatmul.mubr.msk.bf16.vlgmr.msra.gmra.mrb[4].mxu1 %vm522_vm13, %v744_v7 }
 0x53f   :  { %v342_v47 = vpop.f32.mrb[0].mxu1 }
 0x540   :  { %v708_v50 = vpop.f32.mrb[1].mxu1  ;;  %v348_v4 = vsel %vm196_vm5, %v342_v47, 0.0  ;;  %v352_v51 = vmul.f32 %v342_v47, %v342_v47 }
 0x541   :  { %349 = vadd.xlane.f32.xlu1 %v348_v4  ;;  %v345_v52 = vpop.f32.mrb[2].mxu1 }
 0x542   :  { %v709_v53 = vpop.f32.mrb[3].mxu1  ;;  %v353_v54 = vsel %vm196_vm5, %v352_v51, 0.0 }
 0x543   :  { %354 = vadd.xlane.f32.xlu0 %v353_v54 }
 0x547   :  { %v1016_v13 = vpop.f32.mrb[4].mxu1 }
 0x548   :  { %v722_v15 = vpop.f32.mrb[5].mxu1  ;;  %v571_v20 = vsel %vm196_vm5, %v1016_v13, 0.0  ;;  %v579_v44 = vmul.f32 %v1016_v13, %v1016_v13 }
 0x549   :  { %v1018_v17 = vpop.f32.mrb[6].mxu1 }
 0x54a   :  { %v723_v19 = vpop.f32.mrb[7].mxu1  ;;  %v574_v21 = vsel %vm196_vm5, %v1018_v17, 0.0  ;;  %v580_v43 = vmul.f32 %v1018_v17, %v1018_v17  ;;  %v581_v46 = vsel %vm196_vm5, %v579_v44, 0.0 }
 0x54b   :  { %v599_v19 = vld [vmem:[%s1139_s12] sm:$0xff] }
 0x54c   :  { %v584_v45 = vsel %vm196_vm5, %v580_v43, 0.0 }
 0x559   :  { %374 = vperm.xlu0 %742, %v371_v55  }
 0x5ce   :  { %v350_v56 = vpop.xlane.xlu1 %349 }
 0x5cf   :  { %v351_v57 = vmul.f32 0.03125, %v350_v56 }
 0x5d0   :  { %v355_v58 = vpop.xlane.xlu0 %354 }
 0x5d1   :  { %v357_v60 = vmul.f32 %v351_v57, %v351_v57  ;;  %v356_v61 = vmul.f32 0.03125, %v355_v58  ;;  %v364_v62 = vsub.f32 %v342_v47, %v351_v57 }
 0x5d3   :  { %v358_v63 = vsub.f32 %v356_v61, %v357_v60 }
 0x5d5   :  { %v359_v0 = vmax.f32 %v358_v63, 0.0 }
 0x5d7   :  { %v360_v1 = vadd.f32 1e-05, %v359_v0 }
 0x5d8   :  { %v375_v10 = vpop.permute.xlu0 %374 }
 0x5d9   :  { %748 = vrsqrt.f32 %v360_v1 }
 0x5e3   :  { %v749_v3 = vpop.eup %748 }
 0x5e4   :  { %v363_v6 = vmul.f32 %v749_v3, %v362_v2 }
 0x5e6   :  { %367 = vperm.xlu1 %743, %v363_v6  }
 0x665   :  { %v368_v8 = vpop.permute.xlu1 %367 }
 0x666   :  { %v370_v9 = vmul.f32 %v368_v8, %v364_v62 }
 0x668   :  { %v377_v11 = vadd.f32 %v375_v10, %v370_v9 }
 0x66a   :  { %v378_v12 = vmax.f32 %v377_v11, 0.0 }
 0x66c   :  { %380 = vrot.lane.b32.xlu1 %v378_v12, %s795_s21 }
 0x6de   :  { %v381_v14 = vpop.permute.xlu1 %380 }
 0x6df   :  { %v384_v16 = vsel %vm383_vm15, 0.0, %v381_v14 }
 0x6e0   :  { %v386_v18 = vsel %vm385_vm1, %v384_v16, 0.0  ;;  %v600_v16 = vld [vmem:[%s1139_s12 + $0x8] sm:$0xff] }
 0x6e1   :  { %393 = vrot.lane.b32.xlu0 %v386_v18, %s786_s0  ;;  %389 = vrot.lane.b32.xlu1 %v386_v18, %s787_s19 }
 0x700   :  { %572 = vadd.xlane.f32.xlu0 %v571_v20 }
 0x705   :  { %575 = vadd.xlane.f32.xlu1 %v574_v21 }
 0x753   :  { %v394_v22 = vpop.permute.xlu0 %393  ;;  %v390_v23 = vpop.permute.xlu1 %389 }
 0x754   :  { %v396_v24 = vsel %vm954_vm4, %v394_v22, 0.0  ;;  %v675_v26 = vpack.c.bf16 %v390_v23, %v386_v18  ;;  %v501_v23 = vld [vmem:[%s1137_s10 + $0x8] sm:$0xff]  ;;  %vm1163_vm4 = vmmov %vm1160_vm0 }
 0x755   :  { %v400_v27 = vpack.c.bf16 %v396_v24, %v396_v24 }
 0x756   :  { %711 = vmatpush3.bf16.msk.msra.mxu0 %vm674_vm2, %v675_v26  ;;  %v500_v26 = vld [vmem:[%s1137_s10] sm:$0xff] }
 0x757   :  { %712 = vmatprep.subr.bf16.mxu0 %v785_v5  ;;  %v411_v28 = vsel %vm188_vm14, %v400_v27, 0  ;;  %v482_v27 = vld [vmem:[%s1136_s9] sm:$0xff]  ;;  %vm1162_vm14 = vmmov %vm1160_vm0 }
 0x75a   :  { %713 = vmatpush3.bf16.msra.mxu0 %v411_v28 }
 0x75d   :  { %715 = vmatmul.mubr.msk.bf16.vlgmr.msra.gmra.mrb[4].mxu0 %vm406_vm6, %v745_v29  ;;  %v483_v29 = vld [vmem:[%s1136_s9 + $0x8] sm:$0xff]  ;;  %s796_s9 = smov 112  }
 0x78d   :  { %v573_v36 = vpop.xlane.xlu0 %572 }
 0x78e   :  { %v1037_v30 = vmul.f32 0.03125, %v573_v36 }
 0x790   :  { %v603_v5 = vsub.f32 %v1016_v13, %v1037_v30  ;;  %v589_v63 = vmul.f32 %v1037_v30, %v1037_v30 }
 0x792   :  { %v576_v39 = vpop.xlane.xlu1 %575 }
 0x793   :  { %v1039_v59 = vmul.f32 0.03125, %v576_v39 }
 0x795   :  { %v604_v31 = vsub.f32 %v1018_v17, %v1039_v59  ;;  %v590_v55 = vmul.f32 %v1039_v59, %v1039_v59 }
 0x830   :  { %v1045_v32 = vpop.f32.mrb[4].mxu0 }
 0x831   :  { %v716_v33 = vpop.f32.mrb[5].mxu0  ;;  %v454_v34 = vsel %vm196_vm5, %v1045_v32, 0.0  ;;  %v462_v41 = vmul.f32 %v1045_v32, %v1045_v32 }
 0x832   :  { %v1049_v35 = vpop.f32.mrb[6].mxu0  ;;  %455 = vadd.xlane.f32.xlu1 %v454_v34  ;;  %v617_v33 = vld [vmem:[%s1140_s13] sm:$0xff] }
 0x833   :  { %v717_v37 = vpop.f32.mrb[7].mxu0  ;;  %v457_v38 = vsel %vm196_vm5, %v1049_v35, 0.0  ;;  %v463_v40 = vmul.f32 %v1049_v35, %v1049_v35  ;;  %v464_v25 = vsel %vm196_vm5, %v462_v41, 0.0 }
 0x834   :  { %458 = vadd.xlane.f32.xlu0 %v457_v38 }
 0x835   :  { %v467_v42 = vsel %vm196_vm5, %v463_v40, 0.0 }
 0x836   :  { %468 = vadd.xlane.f32.xlu1 %v467_v42 }
 0x838   :  { %465 = vadd.xlane.f32.xlu0 %v464_v25 }
 0x83a   :  { %585 = vadd.xlane.f32.xlu1 %v584_v45 }
 0x83c   :  { %582 = vadd.xlane.f32.xlu0 %v581_v46 }
 0x8bf   :  { %v456_v48 = vpop.xlane.xlu1 %455 }
 0x8c0   :  { %v1065_v49 = vmul.f32 0.03125, %v456_v48 }
 0x8c1   :  { %v459_v47 = vpop.xlane.xlu0 %458 }
 0x8c2   :  { %v1067_v50 = vmul.f32 0.03125, %v459_v47  ;;  %v486_v4 = vsub.f32 %v1045_v32, %v1065_v49  ;;  %v472_v57 = vmul.f32 %v1065_v49, %v1065_v49  ;;  %v618_v32 = vld [vmem:[%s1140_s13 + $0x8] sm:$0xff]  ;;  %s797_s13 = smov [#allocation2]  }
 0x8c3   :  { %v469_v51 = vpop.xlane.xlu1 %468  ;;  %s653_s4 = sshll.u32 %s797_s13, 4  ;;  %s654_s4 = int_to_ptr.vmem [resolvable:$true] %s653_s4 }
 0x8c4   :  { %v487_v52 = vsub.f32 %v1049_v35, %v1067_v50  ;;  %v473_v58 = vmul.f32 %v1067_v50, %v1067_v50  ;;  %v471_v60 = vmul.f32 0.03125, %v469_v51  ;;  %s758_s3 = scalar_lea.vmem %s654_s4, 512  ;;  %p763_p1 = scmp.lt.s32.totalorder %s654_s4, %s654_s4 }
 0x8c5   :  { %v466_v53 = vpop.xlane.xlu0 %465  ;;  %p759_p0 = scmp.ne.s32.totalorder %s654_s4, %s758_s3  ;;  %p764_p2 = scmp.lt.s32.totalorder %s758_s3, %s758_s3 }
 0x8c6   :  { %v470_v54 = vmul.f32 0.03125, %v466_v53  ;;  %v475_v3 = vsub.f32 %v471_v60, %v473_v58 }
 0x8c7   :  { %v586_v56 = vpop.xlane.xlu1 %585  ;;  %p765_p3 = por %p764_p2, %p763_p1 }
 0x8c8   :  { %v588_v61 = vmul.f32 0.03125, %v586_v56  ;;  %v474_v0 = vsub.f32 %v470_v54, %v472_v57  ;;  %v477_v11 = vmax.f32 %v475_v3, 0.0 }
 0x8c9   :  { %v583_v62 = vpop.xlane.xlu0 %582  ;;  %p766_p4 = pnand %p765_p3, %p759_p0 }
 0x8ca   :  { %v592_v1 = vsub.f32 %v588_v61, %v590_v55  ;;  %v587_v2 = vmul.f32 0.03125, %v583_v62  ;;  %v476_v8 = vmax.f32 %v474_v0, 0.0  ;;  %v479_v15 = vadd.f32 1e-05, %v477_v11 }
 0x8cc   :  { %v594_v6 = vmax.f32 %v592_v1, 0.0  ;;  %v591_v7 = vsub.f32 %v587_v2, %v589_v63  ;;  %v478_v14 = vadd.f32 1e-05, %v476_v8 }
 0x8ce   :  { %v596_v9 = vadd.f32 1e-05, %v594_v6  ;;  %v593_v10 = vmax.f32 %v591_v7, 0.0 }
 0x8d0   :  { %750 = vrsqrt.f32 %v596_v9  ;;  %v595_v12 = vadd.f32 1e-05, %v593_v10 }
 0x8d2   :  { %752 = vrsqrt.f32 %v595_v12 }
 0x8d3   :  { %754 = vrsqrt.f32 %v478_v14 }
 0x8d4   :  { %756 = vrsqrt.f32 %v479_v15 }
 0x8da   :  { %v751_v18 = vpop.eup %750 }
 0x8db   :  { %v602_v20 = vmul.f32 %v751_v18, %v600_v16 }
 0x8dc   :  { %v753_v21 = vpop.eup %752 }
 0x8dd   :  { %612 = vperm.xlu0 %742, %v602_v20   ;;  %v601_v22 = vmul.f32 %v753_v21, %v599_v19  ;;  %v755_v24 = vpop.eup %754 }
 0x8de   :  { %v757_v28 = vpop.eup %756  ;;  %v484_v36 = vmul.f32 %v755_v24, %v482_v27 }
 0x8df   :  { %607 = vperm.xlu1 %743, %v601_v22   ;;  %v485_v39 = vmul.f32 %v757_v28, %v483_v29 }
 0x8e1   :  { %509 = vperm.xlu0 %742, %v501_v23  }
 0x8e3   :  { %504 = vperm.xlu1 %743, %v500_v26  }
 0x8e5   :  { %490 = vperm.xlu0 %742, %v484_v36  }
 0x8e7   :  { %495 = vperm.xlu1 %743, %v485_v39  }
 0x8e9   :  { %626 = vperm.xlu0 %742, %v618_v32  }
 0x8eb   :  { %621 = vperm.xlu1 %743, %v617_v33  }
 0x95c   :  { %v613_v34 = vpop.permute.xlu0 %612 }
 0x95d   :  { %v616_v42 = vmul.f32 %v613_v34, %v604_v31 }
 0x95e   :  { %v608_v35 = vpop.permute.xlu1 %607 }
 0x95f   :  { %v615_v45 = vmul.f32 %v608_v35, %v603_v5 }
 0x960   :  { %v510_v37 = vpop.permute.xlu0 %509 }
 0x962   :  { %v505_v38 = vpop.permute.xlu1 %504 }
 0x964   :  { %v491_v40 = vpop.permute.xlu0 %490 }
 0x965   :  { %v498_v43 = vmul.f32 %v491_v40, %v486_v4 }
 0x966   :  { %v496_v41 = vpop.permute.xlu1 %495 }
 0x967   :  { %v499_v25 = vmul.f32 %v496_v41, %v487_v52  ;;  %v512_v47 = vadd.f32 %v505_v38, %v498_v43 }
 0x968   :  { %v627_v44 = vpop.permute.xlu0 %626 }
 0x969   :  { %v513_v46 = vadd.f32 %v510_v37, %v499_v25  ;;  %v630_v48 = vadd.f32 %v627_v44, %v616_v42 }
 0x96a   :  { %v622_v49 = vpop.permute.xlu1 %621 }
 0x96b   :  { %v632_v50 = vadd.f32 %v630_v48, %v513_v46  ;;  %v629_v51 = vadd.f32 %v622_v49, %v615_v45 }
 0x96d   :  { %v634_v53 = vmax.f32 %v632_v50, 0.0  ;;  %v631_v54 = vadd.f32 %v629_v51, %v512_v47 }
 0x96f   :  { %636 = vst.msk [vmem:[#allocation2 + $0x8] sm:$0xff] %vm1160_vm0, %v634_v53  ;;  %v633_v55 = vmax.f32 %v631_v54, 0.0  ;;  %641 = vrot.lane.b32.xlu0 %v634_v53, %s796_s9 }
 0x971   :  { %635 = vst.msk [vmem:[#allocation2] sm:$0xff] %vm1161_vm3, %v633_v55  ;;  %639 = vrot.lane.b32.xlu1 %v633_v55, %s796_s9 }
 0x9e1   :  { %v642_v13 = vpop.permute.xlu0 %641 }
 0x9e2   :  { %647 = vst.msk [vmem:[#allocation2 + $0x18] sm:$0xff] %vm1162_vm14, %v642_v13 }
 0x9e3   :  { %v640_v17 = vpop.permute.xlu1 %639 }
 0x9e4   :  { %646 = vst.msk [vmem:[#allocation2 + $0x10] sm:$0xff] %vm1163_vm4, %v640_v17 }
 0x9e5   :  { %769 = shalt.err (!%p766_p4)
}
 0x9e6   :  { %s770_s16 = scalar_lea.hbm %s1141_s14, 512 }
 0x9e7   :  { %p771_p5 = scmp.ne.s32.totalorder %s1141_s14, %s770_s16  ;;  %p774_p6 = scmp.lt.u32.totalorder %s770_s16, %s1141_s14 }
 0x9e9   :  { %p776_p7 = pnand %p774_p6, %p771_p5 }
 0x9eb   :  { %779 = shalt.err (!%p776_p7)
}
 0x9ec   :  { %s798_s21 = smov 128   ;;  %s799_s6 = smov 8  }
 0x9ed   :  { %659 = dma.vmem_to_hbm [thread:$0]  %s654_s4, 512, %s1141_s14, [#allocation3], %s798_s21, %s798_s21, %s799_s6  }
 0x9ee   :  { %780 = dma.done.wait [#allocation3], 512  }
 0x9ef   :  { %781 = vsyncadd [#allocation3], 4294966784 }
 0x9f0   :  { %663 = vsyncpa [#allocation3], 1 }

</bundles_post_ra>
